<compile_context>
chip_gen: v5e
topology: v5e:2x2
jax: 0.10.0
libtpu: 0.0.40
codegen_flags: <defaults>
</compile_context>

<pallas_src>
import jax
import jax.numpy as jnp
from jax.experimental import pallas as pl
from jax.experimental.pallas import tpu as pltpu

_LANE = 128
_NEG_FILL = -1e30          # plain Python float: NaN-free stand-in for -inf


# --------------------------------------------------------------------------
# kernel
# --------------------------------------------------------------------------
def _pair_log_softmax(x0, x1):
    """log_softmax over the 2-element axis {x0, x1}, per row, without concat."""
    mx = jnp.maximum(x0, x1)
    lse = mx + jnp.log(jnp.exp(x0 - mx) + jnp.exp(x1 - mx))
    return x0 - lse, x1 - lse


def _make_kernel(hw):
    """hw is a static Python int baked into the kernel (only Python scalars
    are closed over, so nothing is captured as a jaxpr constant)."""
    inv_hw = 1.0 / float(hw)

    def kernel(cls_ref, onehot_ref, seg_ref, out_ref, m_sc, s_sc, res0_sc):
        ch = pl.program_id(1)              # seg channel (0 or 1)
        k = pl.program_id(2)               # spatial chunk within the channel
        nk = pl.num_programs(2)

        # --- reset the running logsumexp accumulators at the start of a channel
        @pl.when(k == 0)
        def _init():
            m_sc[...] = jnp.full(m_sc.shape, -1e30, dtype=jnp.float32)
            s_sc[...] = jnp.zeros(s_sc.shape, dtype=jnp.float32)

        # --- online logsumexp update over this (tb, tc) chunk (f32 in-register)
        chunk = seg_ref[...].astype(jnp.float32)
        m_old = m_sc[...]                                   # (tb, 1)
        s_old = s_sc[...]
        c_max = jnp.max(chunk, axis=1, keepdims=True)
        m_new = jnp.maximum(m_old, c_max)
        s_new = s_old * jnp.exp(m_old - m_new) + jnp.sum(
            jnp.exp(chunk - m_new), axis=1, keepdims=True)
        m_sc[...] = m_new
        s_sc[...] = s_new

        # --- channel finished: fold into seg_pred; finalize after channel 1
        @pl.when(k == nk - 1)
        def _channel_done():
            # seg_pred[:, ch] = logsumexp(seg[:, ch], spatial) / (h*w)
            sp = (m_sc[...] + jnp.log(s_sc[...])) * inv_hw   # (tb, 1)

            @pl.when(ch == 0)
            def _store_ch0():
                res0_sc[...] = sp

            @pl.when(ch == 1)
            def _finalize():
                sp0 = res0_sc[...]
                sp1 = sp
                cls = cls_ref[...].astype(jnp.float32)       # (tb, 3)
                onehot = onehot_ref[...]                     # (tb, 3)

                cp0 = cls[:, 0:1]
                cp1 = cls[:, 1:2] + cls[:, 2:3]
                t0 = onehot[:, 0:1]
                t1 = onehot[:, 1:2] + onehot[:, 2:3]

                lc0, lc1 = _pair_log_softmax(cp0, cp1)       # log_softmax(cls_pred)
                ls0, ls1 = _pair_log_softmax(sp0, sp1)       # log_softmax(seg_pred)
                pc0, pc1 = jnp.exp(lc0), jnp.exp(lc1)        # softmax(cls_pred)
                ps0, ps1 = jnp.exp(ls0), jnp.exp(ls1)        # softmax(seg_pred)

                # F.kl_div(input, target, 'none').sum(-1) == sum target*(log target - input)
                seg_cls_kl = ps0 * (ls0 - lc0) + ps1 * (ls1 - lc1)   # (tb, 1)
                cls_seg_kl = pc0 * (lc0 - ls0) + pc1 * (lc1 - ls1)   # (tb, 1)

                tgt_gt = (t0 > t1).astype(jnp.float32)
                c_gt = (cp0 > cp1).astype(jnp.float32)
                s_gt = (sp0 > sp1).astype(jnp.float32)
                ind1 = (c_gt == tgt_gt).astype(jnp.float32)
                ind2 = (s_gt == tgt_gt).astype(jnp.float32)

                out_ref[...] = cls_seg_kl * ind1 + seg_cls_kl * ind2

    return kernel


# --------------------------------------------------------------------------
# tiling / wrapper
# --------------------------------------------------------------------------
def _vmem_capacity_bytes():
    try:
        info = pltpu.get_tpu_info()
        cap = getattr(info, "vmem_capacity_bytes", None)
        if cap:
            return int(cap)
    except Exception:
        pass
    return 64 * 1024 * 1024      # conservative fallback (v7x per-core VMEM)


def _choose_tiles(b, hw, itemsize, vmem_cap):
    # Batch tile: sublane-aligned; for b >= 16 ensure >= 2 tiles so the
    # "parallel" axis can be sharded across both v7x TensorCores.
    if b <= 8:
        tb = b                            # block dim == full array dim is legal
    else:
        tb = min(32, max(8, ((b // 2) // 8) * 8))

    # Spatial chunk: multiple of 128, sized by a byte budget (dtype-aware),
    # kept well inside the per-generation VMEM (double-buffer + f32 temps).
    block_budget = min(8 * 1024 * 1024, vmem_cap // 14)
    hw128 = ((hw + _LANE - 1) // _LANE) * _LANE
    tc_max = max(_LANE, (block_budget // (tb * itemsize)) // _LANE * _LANE)
    if hw128 <= tc_max:
        num_chunks = 1
        tc = hw128
    else:
        num_chunks = -(-hw128 // tc_max)                       # ceil
        tc = (-(-hw128 // (num_chunks * _LANE))) * _LANE       # ceil to lane mult
    padded_hw = num_chunks * tc
    return tb, tc, num_chunks, padded_hw


def task_interaction_loss(cls_predict, seg_predict, target):
    """cls_predict: (B, 3) float; seg_predict: (B, 2, H, W) float (any float
    dtype); target: (B,) int labels in [0, 3)."""
    b, c = cls_predict.shape
    _, cs, h, w = seg_predict.shape
    assert cs == c - 1 == 2, "module hardcodes 3 cls classes / 2 seg channels"
    hw = h * w

    # One-hot == the module's scatter_ (tiny; stays in JAX).
    onehot = jax.nn.one_hot(target, c, dtype=jnp.float32)

    itemsize = jnp.dtype(seg_predict.dtype).itemsize
    vmem_cap = _vmem_capacity_bytes()
    tb, tc, num_chunks, padded_hw = _choose_tiles(b, hw, itemsize, vmem_cap)

    # Lane-dense 2-D slab (B, 2*padded_hw).  Padding (rare: only when H*W is
    # not already a multiple of the chosen chunking) uses -1e30 so padded
    # lanes contribute exp(...) == 0 to the logsumexp.
    seg3 = seg_predict.reshape(b, cs, hw)
    if padded_hw != hw:
        seg3 = jnp.pad(seg3, ((0, 0), (0, 0), (0, padded_hw - hw)),
                       constant_values=_NEG_FILL)
    seg2d = seg3.reshape(b, cs * padded_hw)

    grid = (pl.cdiv(b, tb), cs, num_chunks)
    vmem_limit = (vmem_cap // 4) * 3      # <= ~48 MiB on v7x, ~96 MiB on v5e/v6e

    out = pl.pallas_call(
        _make_kernel(hw),
        out_shape=jax.ShapeDtypeStruct((b, 1), jnp.float32),
        grid_spec=pltpu.PrefetchScalarGridSpec(
            num_scalar_prefetch=0,
            grid=grid,
            in_specs=[
                pl.BlockSpec((tb, c), lambda i, ch, k: (i, 0)),    # cls_predict
                pl.BlockSpec((tb, c), lambda i, ch, k: (i, 0)),    # one-hot target
                # seg slab: channel selected on the grid via block-index offset
                pl.BlockSpec((tb, tc),
                             lambda i, ch, k: (i, ch * num_chunks + k)),
            ],
            out_specs=pl.BlockSpec((tb, 1), lambda i, ch, k: (i, 0)),
            scratch_shapes=[
                pltpu.VMEM((tb, 1), jnp.float32),   # running max (current channel)
                pltpu.VMEM((tb, 1), jnp.float32),   # running rescaled sum(exp)
                pltpu.VMEM((tb, 1), jnp.float32),   # channel-0 seg_pred result
            ],
        ),
        compiler_params=pltpu.CompilerParams(
            dimension_semantics=("parallel", "arbitrary", "arbitrary"),
            vmem_limit_bytes=vmem_limit,
        ),
    )(cls_predict, onehot, seg2d)

    return jnp.sum(out) / 2.0 / b


# --------------------------------------------------------------------------
# pure-JAX reference (mirror of the PyTorch forward) + test
# --------------------------------------------------------------------------
def _reference(cls_predict, seg_predict, target):
    b, c = cls_predict.shape
    h, w = seg_predict.shape[2], seg_predict.shape[3]
    onehot = jax.nn.one_hot(target, c, dtype=jnp.float32)
    tnew = jnp.stack([onehot[:, 0], onehot[:, 1] + onehot[:, 2]], axis=1)
    cls_pred = jnp.stack([cls_predict[:, 0], cls_predict[:, 1] + cls_predict[:, 2]], axis=1)
    seg_pred = jax.scipy.special.logsumexp(seg_predict, axis=(2, 3)) / (h * w)
    ls_cls = jax.nn.log_softmax(cls_pred, axis=-1)
    ls_seg = jax.nn.log_softmax(seg_pred, axis=-1)
    sm_cls = jnp.exp(ls_cls)
    sm_seg = jnp.exp(ls_seg)
    seg_cls_kl = jnp.sum(sm_seg * (ls_seg - ls_cls), axis=-1)
    cls_seg_kl = jnp.sum(sm_cls * (ls_cls - ls_seg), axis=-1)
    tgt_gt = tnew[:, 0] > tnew[:, 1]
    ind1 = ((cls_pred[:, 0] > cls_pred[:, 1]) == tgt_gt).astype(jnp.float32)
    ind2 = ((seg_pred[:, 0] > seg_pred[:, 1]) == tgt_gt).astype(jnp.float32)
    return jnp.sum(cls_seg_kl * ind1 + seg_cls_kl * ind2) / 2.0 / b


if __name__ == "__main__":
    key = jax.random.PRNGKey(0)
    k1, k2, k3 = jax.random.split(key, 3)

    B, C, H, W = 4, 3, 16, 16
    cls_predict = jax.random.normal(k1, (B, C), dtype=jnp.float32)
    seg_predict = jax.random.normal(k2, (B, C - 1, H, W), dtype=jnp.float32)
    target = jax.random.randint(k3, (B,), 0, C, dtype=jnp.int32)

    loss = jax.block_until_ready(task_interaction_loss(cls_predict, seg_predict, target))
    ref = jax.block_until_ready(_reference(cls_predict, seg_predict, target))
    assert jnp.allclose(loss, ref, atol=1e-5, rtol=1e-4), (loss, ref)

    print("KERNEL_OK")
</pallas_src>

<mosaic_0001>
module attributes {stable_mosaic.version = 11 : i64} {
  func.func @kernel(%arg0: i32, %arg1: i32, %arg2: i32, %arg3: memref<4x3xf32, #tpu.memory_space<vmem>>, %arg4: memref<4x3xf32, #tpu.memory_space<vmem>>, %arg5: memref<4x256xf32, #tpu.memory_space<vmem>>, %arg6: memref<4x1xf32, #tpu.memory_space<vmem>>, %arg7: memref<4x1xf32, #tpu.memory_space<vmem>>, %arg8: memref<4x1xf32, #tpu.memory_space<vmem>>, %arg9: memref<4x1xf32, #tpu.memory_space<vmem>>) attributes {dimension_semantics = [#tpu.dimension_semantics<parallel>, #tpu.dimension_semantics<arbitrary>, #tpu.dimension_semantics<arbitrary>], iteration_bounds = array<i64: 1, 2, 1>, scalar_prefetch = 0 : i64, scratch_operands = 3 : i64, tpu.core_type = #tpu.core_type<tc>, window_params = [{transform_indices = @transform_0, window_bounds = array<i64: 4, 3>}, {transform_indices = @transform_1, window_bounds = array<i64: 4, 3>}, {transform_indices = @transform_2, window_bounds = array<i64: 4, 256>}, {transform_indices = @transform_3, window_bounds = array<i64: 4, 1>}]} {
    %c0_i32 = arith.constant 0 : i32
    %0 = arith.cmpi eq, %arg2, %c0_i32 : i32
    %1 = arith.extui %0 : i1 to i32
    %c0_i32_0 = arith.constant 0 : i32
    %2 = arith.cmpi ne, %1, %c0_i32_0 : i32
    scf.if %2 {
      %cst_13 = arith.constant -1.000000e+30 : f32
      %23 = vector.broadcast %cst_13 : f32 to vector<4x1xf32>
      %c0_14 = arith.constant 0 : index
      %c0_15 = arith.constant 0 : index
      %24 = vector.load %arg7[%c0_14, %c0_15] : memref<4x1xf32, #tpu.memory_space<vmem>>, vector<4x1xf32>
      tpu.vector_store %arg7[%c0_14, %c0_15], %23 {strides = array<i32>} : memref<4x1xf32, #tpu.memory_space<vmem>>, vector<4x1xf32>,
      %cst_16 = arith.constant 0.000000e+00 : f32
      %25 = vector.broadcast %cst_16 : f32 to vector<4x1xf32>
      %c0_17 = arith.constant 0 : index
      %c0_18 = arith.constant 0 : index
      %26 = vector.load %arg8[%c0_17, %c0_18] : memref<4x1xf32, #tpu.memory_space<vmem>>, vector<4x1xf32>
      tpu.vector_store %arg8[%c0_17, %c0_18], %25 {strides = array<i32>} : memref<4x1xf32, #tpu.memory_space<vmem>>, vector<4x1xf32>,
    } else {
    }
    %c0 = arith.constant 0 : index
    %c0_1 = arith.constant 0 : index
    %3 = vector.load %arg5[%c0, %c0_1] : memref<4x256xf32, #tpu.memory_space<vmem>>, vector<4x256xf32>
    %c0_2 = arith.constant 0 : index
    %c0_3 = arith.constant 0 : index
    %4 = vector.load %arg7[%c0_2, %c0_3] : memref<4x1xf32, #tpu.memory_space<vmem>>, vector<4x1xf32>
    %c0_4 = arith.constant 0 : index
    %c0_5 = arith.constant 0 : index
    %5 = vector.load %arg8[%c0_4, %c0_5] : memref<4x1xf32, #tpu.memory_space<vmem>>, vector<4x1xf32>
    %cst = arith.constant dense<0xFF800000> : vector<4xf32>
    %6 = vector.multi_reduction <maximumf>, %3, %cst [1] : vector<4x256xf32> to vector<4xf32>
    %7 = vector.shape_cast %6 : vector<4xf32> to vector<4x1xf32>
    %8 = arith.maximumf %4, %7 : vector<4x1xf32>
    %9 = arith.subf %4, %8 : vector<4x1xf32>
    %10 = math.exp %9 : vector<4x1xf32>
    %11 = arith.mulf %5, %10 : vector<4x1xf32>
    %12 = vector.broadcast %8 : vector<4x1xf32> to vector<4x256xf32>
    %13 = arith.subf %3, %12 : vector<4x256xf32>
    %14 = math.exp %13 : vector<4x256xf32>
    %cst_6 = arith.constant dense<0.000000e+00> : vector<4xf32>
    %15 = vector.multi_reduction <add>, %14, %cst_6 [1] : vector<4x256xf32> to vector<4xf32>
    %16 = vector.shape_cast %15 : vector<4xf32> to vector<4x1xf32>
    %17 = arith.addf %11, %16 : vector<4x1xf32>
    %c0_7 = arith.constant 0 : index
    %c0_8 = arith.constant 0 : index
    %18 = vector.load %arg7[%c0_7, %c0_8] : memref<4x1xf32, #tpu.memory_space<vmem>>, vector<4x1xf32>
    tpu.vector_store %arg7[%c0_7, %c0_8], %8 {strides = array<i32>} : memref<4x1xf32, #tpu.memory_space<vmem>>, vector<4x1xf32>,
    %c0_9 = arith.constant 0 : index
    %c0_10 = arith.constant 0 : index
    %19 = vector.load %arg8[%c0_9, %c0_10] : memref<4x1xf32, #tpu.memory_space<vmem>>, vector<4x1xf32>
    tpu.vector_store %arg8[%c0_9, %c0_10], %17 {strides = array<i32>} : memref<4x1xf32, #tpu.memory_space<vmem>>, vector<4x1xf32>,
    %c0_i32_11 = arith.constant 0 : i32
    %20 = arith.cmpi eq, %arg2, %c0_i32_11 : i32
    %21 = arith.extui %20 : i1 to i32
    %c0_i32_12 = arith.constant 0 : i32
    %22 = arith.cmpi ne, %21, %c0_i32_12 : i32
    scf.if %22 {
      %c0_13 = arith.constant 0 : index
      %c0_14 = arith.constant 0 : index
      %23 = vector.load %arg7[%c0_13, %c0_14] : memref<4x1xf32, #tpu.memory_space<vmem>>, vector<4x1xf32>
      %c0_15 = arith.constant 0 : index
      %c0_16 = arith.constant 0 : index
      %24 = vector.load %arg8[%c0_15, %c0_16] : memref<4x1xf32, #tpu.memory_space<vmem>>, vector<4x1xf32>
      %25 = math.log %24 : vector<4x1xf32>
      %26 = arith.addf %23, %25 : vector<4x1xf32>
      %cst_17 = arith.constant 3.906250e-03 : f32
      %27 = vector.broadcast %cst_17 : f32 to vector<4x1xf32>
      %28 = arith.mulf %26, %27 : vector<4x1xf32>
      %c0_i32_18 = arith.constant 0 : i32
      %29 = arith.cmpi eq, %arg1, %c0_i32_18 : i32
      %30 = arith.extui %29 : i1 to i32
      %c0_i32_19 = arith.constant 0 : i32
      %31 = arith.cmpi ne, %30, %c0_i32_19 : i32
      scf.if %31 {
        %c0_21 = arith.constant 0 : index
        %c0_22 = arith.constant 0 : index
        %35 = vector.load %arg9[%c0_21, %c0_22] : memref<4x1xf32, #tpu.memory_space<vmem>>, vector<4x1xf32>
        tpu.vector_store %arg9[%c0_21, %c0_22], %28 {strides = array<i32>} : memref<4x1xf32, #tpu.memory_space<vmem>>, vector<4x1xf32>,
      } else {
      }
      %c1_i32 = arith.constant 1 : i32
      %32 = arith.cmpi eq, %arg1, %c1_i32 : i32
      %33 = arith.extui %32 : i1 to i32
      %c0_i32_20 = arith.constant 0 : i32
      %34 = arith.cmpi ne, %33, %c0_i32_20 : i32
      scf.if %34 {
        %c0_21 = arith.constant 0 : index
        %c0_22 = arith.constant 0 : index
        %35 = vector.load %arg9[%c0_21, %c0_22] : memref<4x1xf32, #tpu.memory_space<vmem>>, vector<4x1xf32>
        %c0_23 = arith.constant 0 : index
        %c0_24 = arith.constant 0 : index
        %36 = vector.load %arg3[%c0_23, %c0_24] : memref<4x3xf32, #tpu.memory_space<vmem>>, vector<4x3xf32>
        %c0_25 = arith.constant 0 : index
        %c0_26 = arith.constant 0 : index
        %37 = vector.load %arg4[%c0_25, %c0_26] : memref<4x3xf32, #tpu.memory_space<vmem>>, vector<4x3xf32>
        %38 = vector.extract_strided_slice %36 {offsets = [0, 0], sizes = [4, 1], strides = [1, 1]} : vector<4x3xf32> to vector<4x1xf32>
        %39 = vector.extract_strided_slice %36 {offsets = [0, 1], sizes = [4, 1], strides = [1, 1]} : vector<4x3xf32> to vector<4x1xf32>
        %40 = vector.extract_strided_slice %36 {offsets = [0, 2], sizes = [4, 1], strides = [1, 1]} : vector<4x3xf32> to vector<4x1xf32>
        %41 = arith.addf %39, %40 : vector<4x1xf32>
        %42 = vector.extract_strided_slice %37 {offsets = [0, 0], sizes = [4, 1], strides = [1, 1]} : vector<4x3xf32> to vector<4x1xf32>
        %43 = vector.extract_strided_slice %37 {offsets = [0, 1], sizes = [4, 1], strides = [1, 1]} : vector<4x3xf32> to vector<4x1xf32>
        %44 = vector.extract_strided_slice %37 {offsets = [0, 2], sizes = [4, 1], strides = [1, 1]} : vector<4x3xf32> to vector<4x1xf32>
        %45 = arith.addf %43, %44 : vector<4x1xf32>
        %46 = arith.maximumf %38, %41 : vector<4x1xf32>
        %47 = arith.subf %38, %46 : vector<4x1xf32>
        %48 = math.exp %47 : vector<4x1xf32>
        %49 = arith.subf %41, %46 : vector<4x1xf32>
        %50 = math.exp %49 : vector<4x1xf32>
        %51 = arith.addf %48, %50 : vector<4x1xf32>
        %52 = math.log %51 : vector<4x1xf32>
        %53 = arith.addf %46, %52 : vector<4x1xf32>
        %54 = arith.subf %38, %53 : vector<4x1xf32>
        %55 = arith.subf %41, %53 : vector<4x1xf32>
        %56 = arith.maximumf %35, %28 : vector<4x1xf32>
        %57 = arith.subf %35, %56 : vector<4x1xf32>
        %58 = math.exp %57 : vector<4x1xf32>
        %59 = arith.subf %28, %56 : vector<4x1xf32>
        %60 = math.exp %59 : vector<4x1xf32>
        %61 = arith.addf %58, %60 : vector<4x1xf32>
        %62 = math.log %61 : vector<4x1xf32>
        %63 = arith.addf %56, %62 : vector<4x1xf32>
        %64 = arith.subf %35, %63 : vector<4x1xf32>
        %65 = arith.subf %28, %63 : vector<4x1xf32>
        %66 = math.exp %54 : vector<4x1xf32>
        %67 = math.exp %55 : vector<4x1xf32>
        %68 = math.exp %64 : vector<4x1xf32>
        %69 = math.exp %65 : vector<4x1xf32>
        %70 = arith.subf %64, %54 : vector<4x1xf32>
        %71 = arith.mulf %68, %70 : vector<4x1xf32>
        %72 = arith.subf %65, %55 : vector<4x1xf32>
        %73 = arith.mulf %69, %72 : vector<4x1xf32>
        %74 = arith.addf %71, %73 : vector<4x1xf32>
        %75 = arith.subf %54, %64 : vector<4x1xf32>
        %76 = arith.mulf %66, %75 : vector<4x1xf32>
        %77 = arith.subf %55, %65 : vector<4x1xf32>
        %78 = arith.mulf %67, %77 : vector<4x1xf32>
        %79 = arith.addf %76, %78 : vector<4x1xf32>
        %80 = arith.cmpf ogt, %42, %45 : vector<4x1xf32>
        %81 = arith.extui %80 : vector<4x1xi1> to vector<4x1xi32>
        %82 = arith.sitofp %81 : vector<4x1xi32> to vector<4x1xf32>
        %83 = arith.cmpf ogt, %38, %41 : vector<4x1xf32>
        %84 = arith.extui %83 : vector<4x1xi1> to vector<4x1xi32>
        %85 = arith.sitofp %84 : vector<4x1xi32> to vector<4x1xf32>
        %86 = arith.cmpf ogt, %35, %28 : vector<4x1xf32>
        %87 = arith.extui %86 : vector<4x1xi1> to vector<4x1xi32>
        %88 = arith.sitofp %87 : vector<4x1xi32> to vector<4x1xf32>
        %89 = arith.cmpf oeq, %85, %82 : vector<4x1xf32>
        %90 = arith.extui %89 : vector<4x1xi1> to vector<4x1xi32>
        %91 = arith.sitofp %90 : vector<4x1xi32> to vector<4x1xf32>
        %92 = arith.cmpf oeq, %88, %82 : vector<4x1xf32>
        %93 = arith.extui %92 : vector<4x1xi1> to vector<4x1xi32>
        %94 = arith.sitofp %93 : vector<4x1xi32> to vector<4x1xf32>
        %95 = arith.mulf %79, %91 : vector<4x1xf32>
        %96 = arith.mulf %74, %94 : vector<4x1xf32>
        %97 = arith.addf %95, %96 : vector<4x1xf32>
        %c0_27 = arith.constant 0 : index
        %c0_28 = arith.constant 0 : index
        %98 = vector.load %arg6[%c0_27, %c0_28] : memref<4x1xf32, #tpu.memory_space<vmem>>, vector<4x1xf32>
        tpu.vector_store %arg6[%c0_27, %c0_28], %97 {strides = array<i32>} : memref<4x1xf32, #tpu.memory_space<vmem>>, vector<4x1xf32>,
      } else {
      }
    } else {
    }
    return
  }
  func.func @transform_0(%arg0: i32, %arg1: i32, %arg2: i32) -> (i32, i32) {
    %c0_i32 = arith.constant 0 : i32
    %c0_i32_0 = arith.constant 0 : i32
    return %arg0, %c0_i32 : i32, i32
  }
  func.func @transform_1(%arg0: i32, %arg1: i32, %arg2: i32) -> (i32, i32) {
    %c0_i32 = arith.constant 0 : i32
    %c0_i32_0 = arith.constant 0 : i32
    return %arg0, %c0_i32 : i32, i32
  }
  func.func @transform_2(%arg0: i32, %arg1: i32, %arg2: i32) -> (i32, i32) {
    %c1_i32 = arith.constant 1 : i32
    %0 = arith.muli %arg1, %c1_i32 : i32
    %1 = arith.addi %0, %arg2 : i32
    %c0_i32 = arith.constant 0 : i32
    return %arg0, %1 : i32, i32
  }
  func.func @transform_3(%arg0: i32, %arg1: i32, %arg2: i32) -> (i32, i32) {
    %c0_i32 = arith.constant 0 : i32
    %c0_i32_0 = arith.constant 0 : i32
    return %arg0, %c0_i32 : i32, i32
  }
}

</mosaic_0001>

<bundles_post_ra>
// kernel: tpu_custom_call.1
= control target key start
LH: loop header
LB: loop body
LE: loop exit
PB: predicated region body
PF: predicated region fallthrough
CT: control target
= control target key end

     0   :  { %8 = vsyncpa [#allocation6], 0  ;;  %s1020_s0 = inlined_call_operand.hbm [shape: f32[4,3], index: 0, kind: input, shape index: {}]   ;;  %s1021_s1 = inlined_call_operand.hbm [shape: f32[4,3], index: 1, kind: input, shape index: {}]   ;;  %s1022_s2 = inlined_call_operand.hbm [shape: f32[4,512], index: 2, kind: input, shape index: {}]   ;;  %s1023_s3 = inlined_call_operand.vmem [shape: f32[4,1], index: 3, kind: output, shape index: {}]  }
   0x1   :  { %9 = vsyncpa [#allocation8], 0  ;;  %s850_s12 = smov 0   ;;  %s852_s13 = smov 0  }
   0x2   :  { %s854_s14 = smov 0   ;;  %s856_s15 = smov 0  }
   0x3   :  { %s858_s16 = smov 0   ;;  %s860_s17 = smov 0  }
   0x4 LB: > { %s538_s18 = sadd.s32 4294967295, %s819_s17   ;;  %p110_p0 = scmp.ne.s32.totalorder %s803_s13, %s799_s12  ;;  %s819_s17 = sphi %s860_s17, %s15_s17   ;;  %s815_s16 = sphi %s858_s16, %s1032_s16   ;;  %s811_s15 = sphi %s856_s15, %s1031_s15   ;;  %s807_s14 = sphi %s854_s14, %s1030_s14   ;;  %s803_s13 = sphi %s852_s13, %s1029_s13   ;;  %s799_s12 = sphi %s850_s12, %s1028_s12  }
   0x5   : > { %p882_p1 = scmp.eq.s32.totalorder %s538_s18, 0  ;;  %p539_p2 = scmp.ge.s32.totalorder %s819_s17, 1 }
   0x6   : > { %p147_p3 = scmp.lt.s32.totalorder %s819_s17, 3  ;;  %s161_s23 = sshll.u32 %s1020_s0, 4  ;;  %s162_s23 = int_to_ptr.hbm [resolvable:$true] %s161_s23 }
   0x7   : > { %p890_p4 = por %p882_p1, %p110_p0  ;;  %s821_s25 = smov [#allocation5]  }
   0x8   : > { %p897_p5 = pnand %p539_p2, %p147_p3  ;;  %s163_s26 = sshll.u32 %s821_s25, 4  ;;  %s164_s26 = int_to_ptr.vmem [resolvable:$true] %s163_s26 }
   0x9   : > { %s175_s29 = sshll.u32 %s1021_s1, 4  ;;  %s822_s30 = smov [#allocation7]   ;;  %s176_s29 = int_to_ptr.hbm [resolvable:$true] %s175_s29 }
   0xa   : > { %p571_p6 = pneg %p897_p5  ;;  %s177_s4 = sshll.u32 %s822_s30, 4  ;;  %s178_s4 = int_to_ptr.vmem [resolvable:$true] %s177_s4 }
   0xb   : > { %s30_s5 = sadd.s32 1, %s815_s16  ;;  %p104_p9 = scmp.ne.s32.totalorder %s807_s14, %s803_s13 }
   0xc   : > { %p572_p7 = pnand %p571_p6, %p882_p1  ;;  %p32_p8 = scmp.ge.s32.totalorder %s30_s5, 2 }
   0xd   : > { %s97_s6 = sadd.s32 1, %s807_s14  ;;  %p105_p10 = scmp.eq.s32.totalorder %s819_s17, 0 }
   0xe   : > { %574 = dma.hbm_to_vmem [thread:$0]  (!%p572_p7), %s162_s23, 64, %s164_s26, [#allocation6]  }
   0xf   : > { %577 = dma.hbm_to_vmem [thread:$0]  (!%p572_p7), %s176_s29, 64, %s178_s4, [#allocation8]  }
  0x10   : > { %s1034_s5 = smov (%p32_p8, %s30_s5), 0  ;;  %p915_p11 = por %p105_p10, %p104_p9 }
  0x11   : > { %p584_p12 = scmp.lt.s32.totalorder %s819_s17, 2  ;;  %s93_s8 = ssub.s32 %s815_s16, %s1034_s5 }
  0x12   : > { %s188_s9 = sand.u32 1, %s819_s17   ;;  %p95_p13 = scmp.eq.s32.totalorder %s93_s8, 0 }
  0x13   : > { %s190_s10 = sand.u32 1, %s807_s14   ;;  %s560_s12 = sshll.u32 %s815_s16, 3 }
  0x14   : > { %s543_s11 = sshll.u32 %s190_s10, 3  ;;  %s200_s25 = scalar_lea.hbm %s1022_s2, %s560_s12 }
  0x15   : > { %s926_s21 = scalar_select %p95_p13, %s807_s14, %s97_s6  }
  0x16   : > { %s202_s26 = sshll.u32 %s200_s25, 4  ;;  %s192_s27 = scalar_lea.vmem [#allocation9], %s543_s11  ;;  %s203_s26 = int_to_ptr.hbm [resolvable:$true] %s202_s26 }
  0x17   : > { %s204_s28 = sshll.u32 %s192_s27, 4  ;;  %p579_p0 = pnand %p584_p12, %p915_p11  ;;  %s205_s28 = int_to_ptr.vmem [resolvable:$true] %s204_s28 }
  0x18   : > { %s189_s29 = scalar_lea.sflag [#allocation6], %s188_s9  ;;  %213 = sbr.rel (%p897_p5) target bundleno = 1168 (0x490), region = 32 }
  0x19   : > { %581 = dma.hbm_to_vmem [thread:$0]  (!%p579_p0), %s203_s26, 128, %s205_s28, %s189_s29  }
  0x1d   : > { %786 = dma.done.wait (%p882_p1), [#allocation6], 64  }
  0x1e   : > { %788 = vsyncadd (%p882_p1), [#allocation6], 4294967232 }
  0x1f   : > { %790 = dma.done.wait (%p882_p1), [#allocation8], 64  }
  0x20   : > { %792 = vsyncadd (%p882_p1), [#allocation8], 4294967232  ;;  %s225_s30 = sand.u32 1, %s538_s18   ;;  %s227_s4 = sand.u32 1, %s803_s13  }
  0x21   : > { %s549_s24 = sshll.u32 %s227_s4, 3  ;;  %s226_s6 = scalar_lea.sflag [#allocation6], %s225_s30 }
  0x22   : > { %s229_s7 = scalar_lea.vmem [#allocation9], %s549_s24 }
  0x23   : > { %794 = dma.done.wait (%p890_p4), %s226_s6, 128  }
  0x24   : > { %796 = vsyncadd (%p890_p4), %s226_s6, 4294967168  ;;  %vm262_vm0 = vcmask 3072   ;;  %v823_v0 = vmov -1e+30   ;;  %v265_v1 = vld [vmem:[%s229_s7] sm:$0xff]  ;;  %vm274_vm1 = vcmask 1043456  }
  0x25   : > { %263 = vst.msk [vmem:[#allocation2] sm:$0xf] %vm262_vm0, %v823_v0  ;;  %v824_v7 = vmov 0   ;;  %v825_v8 = vmov 0.0   ;;  %v826_v13 = vmov 839922192  }
  0x26   : > { %269 = vst [vmem:[#allocation1] ss:$2 sm:$0xff] %v265_v1  ;;  %644 = vset.pattern.permute.xlu0 %v824_v7  ;;  %v290_v14 = vunpack.c.l.s4 %v826_v13  ;;  %p550_p1 = scmp.ne.s32.totalorder %s811_s15, 0 }
  0x27   : > { %264 = vst.msk [vmem:[#allocation3] sm:$0xf] %vm262_vm0, %v825_v8 }
  0x28   : > { %v291_v15 = vunpack.c.0.s8 %v290_v14 }
  0x2c   : > { %v266_v9 = vld [vmem:[#allocation2] sm:$0xf] }
  0x2d   : > { %v270_v2 = vld.sshfl [vmem:[#allocation1] sm:$0xff pattern:$0x75316420]  ;;  %v271_v3 = vld.sshfl [vmem:[#allocation1 + $0x8] sm:$0xff pattern:$0x75316420] }
  0x2e   : > { %v275_v4 = vsel %vm274_vm1, %v270_v2, -inf  ;;  %v276_v5 = vsel %vm274_vm1, %v271_v3, -inf  ;;  %v267_v28 = vld [vmem:[#allocation3] sm:$0xf] }
  0x2f   : > { %v277_v6 = vmax.f32 %v275_v4, %v276_v5 }
  0x31   : > { %278 = vmax.xlane.f32.xlu0 %v277_v6 }
  0xa4   : > { %v279_v10 = vpop.xlane.xlu0 %278 }
  0xa5   : > { %v280_v11 = vmax.f32 %v266_v9, %v279_v10 }
  0xa7   : > { %v281_v12 = vsub.f32 %v266_v9, %v280_v11  ;;  %310 = vst.msk [vmem:[#allocation2] sm:$0xf] %vm262_vm0, %v280_v11  ;;  %287 = vperm.xlu0 %644, %v280_v11  }
  0xa9   : > { %v282_v26 = vmul.f32 1.442695, %v281_v12 }
  0xae   : > { %v315_v35 = vld [vmem:[#allocation2] sm:$0xf] }
 0x119   : > { %v288_v16 = vpop.permute.xlu0 %287 }
 0x11a   : > { %v292_v17 = vperm.slane %v288_v16, %v291_v15 }
 0x11c   : > { %v294_v18 = vsub.f32 %v265_v1, %v292_v17 }
 0x11e   : > { %v295_v19 = vmul.f32 1.442695, %v294_v18 }
 0x120   : > { %645 = vpow2.f32 %v295_v19 }
 0x121   : > { %647 = vpow2.f32 %v282_v26 }
 0x126   : > { %v646_v20 = vpop.eup %645 }
 0x127   : > { %298 = vst [vmem:[#allocation1] ss:$2 sm:$0xff] %v646_v20  ;;  %v648_v27 = vpop.eup %647 }
 0x128   : > { %v284_v29 = vmul.f32 %v648_v27, %v267_v28 }
 0x12e   : > { %v299_v21 = vld.sshfl [vmem:[#allocation1] sm:$0xff pattern:$0x75316420]  ;;  %v300_v22 = vld.sshfl [vmem:[#allocation1 + $0x8] sm:$0xff pattern:$0x75316420] }
 0x12f   : > { %v303_v23 = vsel %vm274_vm1, %v299_v21, 0.0  ;;  %v304_v24 = vsel %vm274_vm1, %v300_v22, 0.0 }
 0x130   : > { %v305_v25 = vadd.f32 %v304_v24, %v303_v23 }
 0x132   : > { %306 = vadd.xlane.f32.xlu1 %v305_v25 }
 0x1a5   : > { %v307_v30 = vpop.xlane.xlu1 %306 }
 0x1a6   : > { %v308_v31 = vadd.f32 %v307_v30, %v284_v29 }
 0x1a8   : > { %311 = vst.msk [vmem:[#allocation3] sm:$0xf] %vm262_vm0, %v308_v31 }
 0x1af   : > { %v316_v32 = vld [vmem:[#allocation3] sm:$0xf] }
 0x1b0   : > { %649 = vlog2.f32 %v316_v32 }
 0x1b6   : > { %v650_v33 = vpop.eup %649 }
 0x1b7   : > { %v318_v34 = vmul.f32 0.6931472, %v650_v33  ;;  %324 = sbr.rel (%p550_p1) target bundleno = 446 (0x1be), region = 56 }
 0x1b9   : > { %v319_v36 = vadd.f32 %v318_v34, %v315_v35 }
 0x1bb   : > { %v960_v37 = vmul.f32 0.00390625, %v319_v36 }
 0x1bd   : > { %325 = vst.msk [vmem:[#allocation4] sm:$0xf] %vm262_vm0, %v960_v37 }
 0x1be PF: > { %p551_p2 = scmp.ne.s32.totalorder %s811_s15, 1 }
 0x1bf   : > { %s827_s18 = smov (!%p551_p2), 127   ;;  %s828_s19 = smov (!%p551_p2), 1  }
 0x1c0   : > { %329 = sbr.rel (%p551_p2) target bundleno = 1168 (0x490), region = 60 }
 0x1c5   : > { %v966_v38 = vld [vmem:[#allocation5] sm:$0xf]  ;;  %v977_v43 = vld [vmem:[#allocation4] sm:$0xf]  ;;  %v332_v12 = vld [vmem:[#allocation7] sm:$0xf] }
 0x1c6   : > { %334 = vrot.lane.b32.xlu0 %v966_v38, %s827_s18  ;;  %v372_v44 = vmax.f32 %v977_v43, %v960_v37  ;;  %vm425_vm2 = vcmp.gt.f32.partialorder %v977_v43, %v960_v37  ;;  %v829_v29 = vmov 0.0  }
 0x1c7   : > { %v554_v30 = vsel %vm425_vm2, 1.0, %v829_v29 }
 0x1c8   : > { %v373_v45 = vsub.f32 %v977_v43, %v372_v44  ;;  %v376_v46 = vsub.f32 %v960_v37, %v372_v44 }
 0x1ca   : > { %v374_v47 = vmul.f32 1.442695, %v373_v45  ;;  %v377_v48 = vmul.f32 1.442695, %v376_v46 }
 0x1cc   : > { %651 = vpow2.f32 %v374_v47 }
 0x1cd   : > { %653 = vpow2.f32 %v377_v48 }
 0x1d2   : > { %v652_v49 = vpop.eup %651 }
 0x1d3   : > { %v654_v50 = vpop.eup %653 }
 0x1d4   : > { %v379_v51 = vadd.f32 %v654_v50, %v652_v49 }
 0x1d6   : > { %655 = vlog2.f32 %v379_v51 }
 0x1dc   : > { %v656_v54 = vpop.eup %655 }
 0x1dd   : > { %v381_v56 = vmul.f32 0.6931472, %v656_v54 }
 0x1df   : > { %v382_v57 = vadd.f32 %v381_v56, %v372_v44 }
 0x1e1   : > { %v384_v58 = vsub.f32 %v960_v37, %v382_v57  ;;  %v383_v0 = vsub.f32 %v977_v43, %v382_v57 }
 0x1e3   : > { %v389_v2 = vmul.f32 1.442695, %v383_v0  ;;  %v391_v24 = vmul.f32 1.442695, %v384_v58 }
 0x238   : > { %v335_v39 = vpop.permute.xlu0 %334 }
 0x239   : > { %v337_v40 = vadd.f32 %v335_v39, %v966_v38 }
 0x23b   : > { %344 = vrot.lane.b32.xlu0 %v337_v40, %s827_s18 }
 0x243   : > { %405 = vrot.lane.b32.xlu0 %v384_v58, %s828_s19 }
 0x2ad   : > { %v972_v41 = vpop.permute.xlu0 %344 }
 0x2ae   : > { %v347_v42 = vmax.f32 %v966_v38, %v972_v41  ;;  %vm422_vm4 = vcmp.gt.f32.partialorder %v966_v38, %v972_v41 }
 0x2af   : > { %v553_v33 = vsel %vm422_vm4, 1.0, %v829_v29 }
 0x2b0   : > { %352 = vrot.lane.b32.xlu1 %v347_v42, %s828_s19  ;;  %v348_v60 = vsub.f32 %v966_v38, %v347_v42 }
 0x2b2   : > { %v349_v61 = vmul.f32 1.442695, %v348_v60 }
 0x2b5   : > { %v406_v18 = vpop.permute.xlu0 %405 }
 0x322   : > { %v353_v52 = vpop.permute.xlu1 %352 }
 0x323   : > { %v355_v53 = vsub.f32 %v337_v40, %v353_v52 }
 0x325   : > { %v356_v55 = vmul.f32 1.442695, %v355_v53 }
 0x327   : > { %657 = vpow2.f32 %v356_v55 }
 0x328   : > { %659 = vpow2.f32 %v349_v61 }
 0x32d   : > { %v658_v59 = vpop.eup %657 }
 0x32e   : > { %359 = vrot.lane.b32.xlu1 %v658_v59, %s827_s18  ;;  %v660_v62 = vpop.eup %659 }
 0x3a0   : > { %v360_v63 = vpop.permute.xlu1 %359 }
 0x3a1   : > { %v362_v1 = vadd.f32 %v660_v62, %v360_v63 }
 0x3a3   : > { %661 = vlog2.f32 %v362_v1 }
 0x3a4   : > { %663 = vpow2.f32 %v389_v2 }
 0x3a9   : > { %v662_v3 = vpop.eup %661 }
 0x3aa   : > { %v364_v4 = vmul.f32 0.6931472, %v662_v3  ;;  %v664_v7 = vpop.eup %663 }
 0x3ac   : > { %v365_v5 = vadd.f32 %v364_v4, %v347_v42 }
 0x3ae   : > { %368 = vrot.lane.b32.xlu2 %v365_v5, %s828_s19  ;;  %v366_v6 = vsub.f32 %v966_v38, %v365_v5 }
 0x3b0   : > { %v385_v8 = vmul.f32 1.442695, %v366_v6  ;;  %v393_v9 = vsub.f32 %v383_v0, %v366_v6  ;;  %v402_v10 = vsub.f32 %v366_v6, %v383_v0 }
 0x3b2   : > { %665 = vpow2.f32 %v385_v8  ;;  %v394_v11 = vmul.f32 %v664_v7, %v393_v9 }
 0x3b6   : > { %339 = vrot.lane.b32.xlu2 %v332_v12, %s827_s18 }
 0x3b8   : > { %v666_v13 = vpop.eup %665 }
 0x3b9   : > { %v403_v14 = vmul.f32 %v666_v13, %v402_v10 }
 0x408   : > { %v369_v15 = vpop.permute.xlu2 %368 }
 0x409   : > { %v371_v16 = vsub.f32 %v337_v40, %v369_v15 }
 0x40b   : > { %v387_v17 = vmul.f32 1.442695, %v371_v16  ;;  %396 = vrot.lane.b32.xlu1 %v371_v16, %s827_s18  ;;  %v408_v21 = vsub.f32 %v371_v16, %v406_v18 }
 0x40d   : > { %667 = vpow2.f32 %v387_v17 }
 0x40e   : > { %669 = vpow2.f32 %v391_v24 }
 0x410   : > { %v340_v19 = vpop.permute.xlu2 %339 }
 0x411   : > { %v342_v20 = vadd.f32 %v340_v19, %v332_v12 }
 0x413   : > { %v668_v22 = vpop.eup %667  ;;  %416 = vrot.lane.b32.xlu2 %v342_v20, %s827_s18 }
 0x414   : > { %v409_v23 = vmul.f32 %v668_v22, %v408_v21  ;;  %v670_v28 = vpop.eup %669 }
 0x416   : > { %411 = vrot.lane.b32.xlu0 %v409_v23, %s827_s18 }
 0x46d   : > { %v417_v26 = vpop.permute.xlu2 %416 }
 0x46e   : > { %vm419_vm3 = vcmp.gt.f32.partialorder %v332_v12, %v417_v26 }
 0x46f   : > { %v552_v32 = vsel %vm419_vm3, 1.0, %v829_v29 }
 0x470   : > { %vm431_vm5 = vcmp.eq.f32.partialorder %v554_v30, %v552_v32  ;;  %vm428_vm6 = vcmp.eq.f32.partialorder %v553_v33, %v552_v32 }
 0x471   : > { %v556_v35 = vsel %vm431_vm5, 1.0, %v829_v29  ;;  %v555_v40 = vsel %vm428_vm6, 1.0, %v829_v29 }
 0x47d   : > { %v397_v25 = vpop.permute.xlu1 %396 }
 0x47e   : > { %v399_v27 = vsub.f32 %v384_v58, %v397_v25 }
 0x480   : > { %v400_v31 = vmul.f32 %v670_v28, %v399_v27 }
 0x482   : > { %v401_v34 = vadd.f32 %v400_v31, %v394_v11 }
 0x484   : > { %v435_v37 = vmul.f32 %v556_v35, %v401_v34 }
 0x488   : > { %v412_v36 = vpop.permute.xlu0 %411 }
 0x489   : > { %v414_v39 = vadd.f32 %v412_v36, %v403_v14 }
 0x48b   : > { %v434_v42 = vmul.f32 %v555_v40, %v414_v39 }
 0x48d   : > { %v436_v43 = vadd.f32 %v435_v37, %v434_v42 }
 0x48f   : > { %437 = vst.msk [vmem:[%s1023_s3] sm:$0xf] %vm262_vm0, %v436_v43 }
 0x490 PF: > { %s15_s17 = sadd.s32 1, %s819_s17   ;;  %s1028_s12 = smov %s803_s13 }
 0x491   : > { %p12_p3 = scmp.ge.s32.totalorder %s15_s17, 4   ;;  %s1029_s13 = smov %s807_s14 }
 0x492   : > { %s1030_s14 = smov %s926_s21  ;;  %s1031_s15 = smov %s815_s16 }
 0x493   : > { %s1032_s16 = smov %s1034_s5  ;;  %14 = sbr.rel (!%p12_p3) target bundleno = 4 (0x4), region = 97 }
 0x498   :  { %457 = vsyncpa [#allocation6], 1 }
 0x499   :  { %459 = vsyncpa [#allocation6 + $0x1], 1 }
 0x49a   :  { %460 = vsyncpa [#allocation8], 1 }

</bundles_post_ra>
